<compile_context>
chip_gen: v7x
topology: tpu7x:2x2x1
jax: 0.10.0
libtpu: 0.0.40
codegen_flags: <defaults>
</compile_context>

<pallas_src>
import functools
import math

import jax
import jax.numpy as jnp
from jax import lax
from jax.experimental import pallas as pl
from jax.experimental.pallas import tpu as pltpu


# ----------------------------------------------------------------------------
# Tiling configuration
# ----------------------------------------------------------------------------
def _pick_row_tile():
    # v5e MXU is 4x128^2 -> M=128 tiles; v6e/v7x prefer 256-row tiles.
    try:
        kind = jax.devices()[0].device_kind.lower()
    except Exception:
        return 128
    return 128 if "v5" in kind else 256


_TM_MAX = _pick_row_tile()
_ROW_ALIGN = 16                      # bf16 sublane packing (also covers f32's 8)
_VMEM_LIMIT = 32 * 1024 * 1024       # fits v5e/v6e/v7x scoped-VMEM budgets


def _round_up(x, m):
    return ((x + m - 1) // m) * m


def _row_plan(m):
    tm = min(_TM_MAX, _round_up(m, _ROW_ALIGN))
    mp = _round_up(m, tm)
    return tm, mp


def _pad_rows(x, mp):
    m = x.shape[0]
    if mp != m:
        x = jnp.pad(x, ((0, mp - m),) + ((0, 0),) * (x.ndim - 1))
    return x


def _cparams():
    return pltpu.CompilerParams(dimension_semantics=("parallel",),
                                vmem_limit_bytes=_VMEM_LIMIT)


# in-kernel elementwise helpers (kept in f32)
def _sigmoid(x):
    return 1.0 / (1.0 + jnp.exp(-x))


def _softplus(x):
    # softplus with PyTorch-style threshold; log(1+exp) to keep lowering simple
    return jnp.where(x > 20.0, x, jnp.log(1.0 + jnp.exp(jnp.minimum(x, 20.0))))


# ----------------------------------------------------------------------------
# Pallas kernels
# ----------------------------------------------------------------------------
def _linear_kernel(x_ref, w_ref, b_ref, o_ref, *, activation):
    y = jnp.dot(x_ref[...], w_ref[...], preferred_element_type=jnp.float32)
    y = y + b_ref[...]
    if activation == "relu":
        y = jnp.maximum(y, 0.0)
    o_ref[...] = y


def _fused_mlp2_kernel(*refs, n_in, act_last):
    # refs: x_0..x_{n-1}, w1_0..w1_{n-1}, b1, w2, b2, out
    xs = refs[:n_in]
    ws = refs[n_in:2 * n_in]
    b1_ref, w2_ref, b2_ref, o_ref = refs[2 * n_in:2 * n_in + 4]
    h = jnp.dot(xs[0][...], ws[0][...], preferred_element_type=jnp.float32)
    for xr, wr in zip(xs[1:], ws[1:]):
        h = h + jnp.dot(xr[...], wr[...], preferred_element_type=jnp.float32)
    h = jnp.maximum(h + b1_ref[...], 0.0)
    # TODO(synk): at production hidden sizes, spill h to a VMEM scratch instead
    # of holding it purely in vregs (scratch_shapes=[pltpu.VMEM((tm, H), f32)]).
    y = jnp.dot(h.astype(jnp.bfloat16), w2_ref[...],
                preferred_element_type=jnp.float32) + b2_ref[...]
    if act_last:
        y = jnp.maximum(y, 0.0)
    o_ref[...] = y


def _mamba_dbc_kernel(x_ref, w_ref, b_ref, o_ref, *, n_delta):
    # one matmul producing [delta | B | C]; softplus only on the delta lanes
    y = jnp.dot(x_ref[...], w_ref[...], preferred_element_type=jnp.float32)
    y = y + b_ref[...]
    lane = lax.broadcasted_iota(jnp.int32, y.shape, 1)
    o_ref[...] = jnp.where(lane < n_delta, _softplus(y), y)


def _mamba_out_kernel(y_ref, xc_ref, z_ref, d_ref, w_ref, o_ref):
    y = y_ref[...] + d_ref[...] * xc_ref[...]
    z = z_ref[...]
    g = y * (z * _sigmoid(z))                      # silu gate
    o_ref[...] = jnp.dot(g.astype(jnp.bfloat16), w_ref[...],
                         preferred_element_type=jnp.float32)


def _gnn_edge_kernel(e_ref, w_ref, b_ref, hs_ref, hd_ref, a2s_ref, a3d_ref,
                     eji_ref, sig_ref, mf_ref, mb_ref):
    eji = jnp.dot(e_ref[...], w_ref[...], preferred_element_type=jnp.float32)
    eji = eji + b_ref[...] + hs_ref[...] + hd_ref[...]
    sig = _sigmoid(eji)
    eji_ref[...] = eji
    sig_ref[...] = sig
    mf_ref[...] = sig * a2s_ref[...]
    mb_ref[...] = sig * a3d_ref[...]


# ----------------------------------------------------------------------------
# Kernel wrappers
# ----------------------------------------------------------------------------
def pallas_linear(x, w, b, activation=None):
    """y = act(x @ w + b); x:(M,K) w:(K,N) b:(N,). bf16 MXU, f32 accumulate."""
    m, k = x.shape
    n = w.shape[1]
    tm, mp = _row_plan(m)
    xp = _pad_rows(x.astype(jnp.bfloat16), mp)
    out = pl.pallas_call(
        functools.partial(_linear_kernel, activation=activation),
        out_shape=jax.ShapeDtypeStruct((mp, n), jnp.float32),
        grid=(mp // tm,),
        in_specs=[
            pl.BlockSpec((tm, k), lambda i: (i, 0)),
            pl.BlockSpec((k, n), lambda i: (0, 0)),
            pl.BlockSpec((1, n), lambda i: (0, 0)),
        ],
        out_specs=pl.BlockSpec((tm, n), lambda i: (i, 0)),
        compiler_params=_cparams(),
    )(xp, w.astype(jnp.bfloat16), b.reshape(1, n).astype(jnp.float32))
    return out[:m]


def pallas_mlp2(xs, w1s, b1, w2, b2, act_last=False):
    """y = [relu]( relu( sum_i xs[i] @ w1s[i] + b1 ) @ w2 + b2 ).

    Multiple inputs replace a concat(x_i) @ concat_rows(w1) without ever
    materializing the concatenated tensor in HBM."""
    if not isinstance(xs, (list, tuple)):
        xs, w1s = [xs], [w1s]
    n_in = len(xs)
    m = xs[0].shape[0]
    hdim = w1s[0].shape[1]
    n = w2.shape[1]
    tm, mp = _row_plan(m)
    xps = [_pad_rows(x.astype(jnp.bfloat16), mp) for x in xs]

    in_specs = [pl.BlockSpec((tm, x.shape[1]), lambda i: (i, 0)) for x in xps]
    in_specs += [pl.BlockSpec((w.shape[0], hdim), lambda i: (0, 0)) for w in w1s]
    in_specs += [pl.BlockSpec((1, hdim), lambda i: (0, 0)),
                 pl.BlockSpec((hdim, n), lambda i: (0, 0)),
                 pl.BlockSpec((1, n), lambda i: (0, 0))]
    args = xps + [w.astype(jnp.bfloat16) for w in w1s] + [
        b1.reshape(1, hdim).astype(jnp.float32),
        w2.astype(jnp.bfloat16),
        b2.reshape(1, n).astype(jnp.float32)]

    out = pl.pallas_call(
        functools.partial(_fused_mlp2_kernel, n_in=n_in, act_last=act_last),
        out_shape=jax.ShapeDtypeStruct((mp, n), jnp.float32),
        grid=(mp // tm,),
        in_specs=in_specs,
        out_specs=pl.BlockSpec((tm, n), lambda i: (i, 0)),
        compiler_params=_cparams(),
    )(*args)
    return out[:m]


def pallas_mamba_dbc(xc, w_cat, b_cat, n_delta):
    m, k = xc.shape
    n = w_cat.shape[1]
    tm, mp = _row_plan(m)
    xp = _pad_rows(xc.astype(jnp.bfloat16), mp)
    out = pl.pallas_call(
        functools.partial(_mamba_dbc_kernel, n_delta=n_delta),
        out_shape=jax.ShapeDtypeStruct((mp, n), jnp.float32),
        grid=(mp // tm,),
        in_specs=[pl.BlockSpec((tm, k), lambda i: (i, 0)),
                  pl.BlockSpec((k, n), lambda i: (0, 0)),
                  pl.BlockSpec((1, n), lambda i: (0, 0))],
        out_specs=pl.BlockSpec((tm, n), lambda i: (i, 0)),
        compiler_params=_cparams(),
    )(xp, w_cat.astype(jnp.bfloat16), b_cat.reshape(1, n).astype(jnp.float32))
    return out[:m]


def pallas_mamba_out(y, xc, z, d_vec, w_out):
    m, ed = y.shape
    n = w_out.shape[1]
    tm, mp = _row_plan(m)
    yp = _pad_rows(y.astype(jnp.float32), mp)
    xcp = _pad_rows(xc.astype(jnp.float32), mp)
    zp = _pad_rows(z.astype(jnp.float32), mp)
    row = pl.BlockSpec((tm, ed), lambda i: (i, 0))
    out = pl.pallas_call(
        _mamba_out_kernel,
        out_shape=jax.ShapeDtypeStruct((mp, n), jnp.float32),
        grid=(mp // tm,),
        in_specs=[row, row, row,
                  pl.BlockSpec((1, ed), lambda i: (0, 0)),
                  pl.BlockSpec((ed, n), lambda i: (0, 0))],
        out_specs=pl.BlockSpec((tm, n), lambda i: (i, 0)),
        compiler_params=_cparams(),
    )(yp, xcp, zp, d_vec.reshape(1, ed).astype(jnp.float32),
      w_out.astype(jnp.bfloat16))
    return out[:m]


def pallas_gnn_edge(e, w_b1, b_b1, b2h_src, b3h_dst, a2h_src, a3h_dst):
    """Fused B1e matmul + e_ji add + sigmoid + gated messages."""
    m, hdim = e.shape
    tm, mp = _row_plan(m)
    ep = _pad_rows(e.astype(jnp.bfloat16), mp)
    pads = [_pad_rows(t.astype(jnp.float32), mp)
            for t in (b2h_src, b3h_dst, a2h_src, a3h_dst)]
    row = pl.BlockSpec((tm, hdim), lambda i: (i, 0))
    outs = pl.pallas_call(
        _gnn_edge_kernel,
        out_shape=tuple(jax.ShapeDtypeStruct((mp, hdim), jnp.float32)
                        for _ in range(4)),
        grid=(mp // tm,),
        in_specs=[row,
                  pl.BlockSpec((hdim, hdim), lambda i: (0, 0)),
                  pl.BlockSpec((1, hdim), lambda i: (0, 0)),
                  row, row, row, row],
        out_specs=[row, row, row, row],
        compiler_params=_cparams(),
    )(ep, w_b1.astype(jnp.bfloat16), b_b1.reshape(1, hdim).astype(jnp.float32),
      *pads)
    return tuple(o[:m] for o in outs)


# ----------------------------------------------------------------------------
# Plain-JAX helpers (glue / no clean single-kernel Pallas equivalent)
# ----------------------------------------------------------------------------
def rmsnorm(x, w, eps=1e-5):
    return x * lax.rsqrt(jnp.mean(x * x, axis=-1, keepdims=True) + eps) * w


def batchnorm(x, gamma, beta, eps=1e-5):
    # nn.BatchNorm1d(track_running_stats=False): always uses batch statistics.
    mu = jnp.mean(x, axis=0, keepdims=True)
    var = jnp.var(x, axis=0, keepdims=True)
    return (x - mu) * lax.rsqrt(var + eps) * gamma + beta


def causal_depthwise_conv(x, w, b):
    # x: (N, L, ED), w: (ED, K), b: (ED,) -- Conv1d(groups=ED, padding=K-1)[:, :, :L]
    K = w.shape[1]
    L = x.shape[1]
    xp = jnp.pad(x, ((0, 0), (K - 1, 0), (0, 0)))
    y = jnp.zeros_like(x)
    for k in range(K):
        y = y + xp[:, k:k + L, :] * w[:, k][None, None, :]
    return y + b[None, None, :]


def selective_scan(deltaA, BX, C):
    # deltaA, BX: (N, L, ED, Ns);  C: (N, L, Ns)
    # TODO(synk): sequential SSM recurrence kept as lax.scan (not a Pallas kernel).
    dA = jnp.moveaxis(deltaA, 1, 0)
    bx = jnp.moveaxis(BX, 1, 0)

    def step(h, inp):
        da_t, bx_t = inp
        h = da_t * h + bx_t
        return h, h

    h0 = jnp.zeros(deltaA.shape[:1] + deltaA.shape[2:], jnp.float32)
    _, hs = lax.scan(step, h0, (dA, bx))
    hs = jnp.moveaxis(hs, 0, 1)  # (N, L, ED, Ns)
    return jnp.einsum("blds,bls->bld", hs, C)


def mamba_block(p, x):
    # x: (N, L, d_model)
    Nn, L, D = x.shape
    ED = p["conv_w"].shape[0]
    d_state = p["A_log"].shape[1]

    xz = pallas_linear(x.reshape(Nn * L, D), p["in_proj_w"],
                       jnp.zeros((2 * ED,), jnp.float32)).reshape(Nn, L, 2 * ED)
    xc, z = jnp.split(xz, 2, axis=-1)

    # TODO(synk): depthwise causal conv + silu kept in plain JAX (seq-dim stencil
    # crosses the row tiling used by the projection kernels).
    xc = causal_depthwise_conv(xc, p["conv_w"], p["conv_b"])
    xc = xc * jax.nn.sigmoid(xc)  # silu

    # Fused x_proj + dt_proj + softplus (delta|B|C lanes in one matmul).
    dbc = pallas_mamba_dbc(xc.reshape(Nn * L, ED), p["dbc_w"], p["dbc_b"],
                           n_delta=ED).reshape(Nn, L, -1)
    delta = dbc[..., :ED]
    Bm = dbc[..., ED:ED + d_state]
    Cm = dbc[..., ED + d_state:]

    A = -jnp.exp(p["A_log"])                                        # (ED, Ns)
    deltaA = jnp.exp(delta[..., None] * A[None, None])              # (N,L,ED,Ns)
    BX = delta[..., None] * Bm[:, :, None, :] * xc[..., None]       # (N,L,ED,Ns)

    y = selective_scan(deltaA, BX, Cm)                              # (N,L,ED)

    # Fused (y + D*xc) * silu(z) @ out_proj.
    out = pallas_mamba_out(y.reshape(Nn * L, ED), xc.reshape(Nn * L, ED),
                           z.reshape(Nn * L, ED), p["D"], p["out_proj_w"])
    return out.reshape(Nn, L, D)


def sym_gated_gcn_layer(p, src, dst, h, e, num_nodes, use_bn):
    # TODO(synk): exact SymGatedGCN layer definition not provided; follows the
    # standard GNNome SymGatedGCN (gated fwd/bwd aggregation + residual).
    h_in, e_in = h, e
    H = h.shape[1]

    # Fused gate projections: one lane-dense (H, 5H) matmul for A1|A2|A3|B2|B3.
    hb = pallas_linear(h, p["W_h_cat"], p["b_h_cat"])
    A1h, A2h, A3h, B2h, B3h = (hb[:, i * H:(i + 1) * H] for i in range(5))

    # TODO(synk): x[src]/x[dst] gathers remain XLA gathers; in-kernel DMA /
    # scalar-prefetch gather not adopted here.
    eji, sigma, mf, mb = pallas_gnn_edge(e, p["B1"][0], p["B1"][1],
                                         B2h[src], B3h[dst], A2h[src], A3h[dst])

    # TODO(synk): DGL update_all scatter-sum kept as jax.ops.segment_sum.
    num_f = jax.ops.segment_sum(mf, dst, num_segments=num_nodes)
    den_f = jax.ops.segment_sum(sigma, dst, num_segments=num_nodes)
    num_b = jax.ops.segment_sum(mb, src, num_segments=num_nodes)
    den_b = jax.ops.segment_sum(sigma, src, num_segments=num_nodes)

    h_new = A1h + num_f / (den_f + 1e-6) + num_b / (den_b + 1e-6)
    e_new = eji
    # TODO(synk): BN stats are a global reduction and message passing sits
    # between the projections and this epilogue, so BN/relu/residual stay as an
    # XLA-fused elementwise chain instead of a matmul-kernel epilogue.
    if use_bn:
        h_new = batchnorm(h_new, p["bn_h_g"], p["bn_h_b"])
        e_new = batchnorm(e_new, p["bn_e_g"], p["bn_e_b"])
    h_new = jax.nn.relu(h_new)
    e_new = jax.nn.relu(e_new)
    return h_in + h_new, e_in + e_new


# ----------------------------------------------------------------------------
# Model
# ----------------------------------------------------------------------------
def model_forward(params, graph, x, e_unused):
    src, dst = graph["src"], graph["dst"]
    reads, read_len = graph["read_data"], graph["read_length"]
    N = x.shape[0]
    H = params["lin2_node"][0].shape[1]

    # node MLP: linear1_node -> relu -> linear2_node (fused 2-layer kernel)
    x = pallas_mlp2([x], [params["lin1_node"][0]], params["lin1_node"][1],
                    params["lin2_node"][0], params["lin2_node"][1],
                    act_last=False)

    # Mamba over reads, pick last valid timestep per node
    h = reads.astype(jnp.float32)
    for lp in params["mamba_layers"]:
        h = h + mamba_block(lp, rmsnorm(h, lp["norm_w"]))
    idx = read_len - 1
    x2 = h[jnp.arange(N), idx]                                   # (N, 4)
    x2 = pallas_linear(x2, *params["linear_base"])               # (N, H)

    # edge MLP on concat(src x, dst x, src x2, dst x2): concat folded into a
    # 4-way split-weight fused kernel (no (E, 4H) intermediate in HBM).
    w1e, b1e = params["lin1_edge"]
    e = pallas_mlp2([x[src], x[dst], x2[src], x2[dst]],
                    [w1e[:H], w1e[H:2 * H], w1e[2 * H:3 * H], w1e[3 * H:]],
                    b1e, params["lin2_edge"][0], params["lin2_edge"][1],
                    act_last=True)

    # mix mamba features into node features (same split-weight trick)
    wm1, bm1 = params["mix1"]
    x = pallas_mlp2([x, x2], [wm1[:H], wm1[H:]], bm1,
                    params["mix2"][0], params["mix2"][1], act_last=False)

    # SymGatedGCN processor
    for lp in params["gnn_layers"]:
        x, e = sym_gated_gcn_layer(lp, src, dst, x, e, N, params["batch_norm"])

    # ScorePredictor: concat(src x, dst x, e) -> MLP -> (E, 1)
    wp1, bp1 = params["pred_w1"]
    scores = pallas_mlp2([x[src], x[dst], e],
                         [wp1[:H], wp1[H:2 * H], wp1[2 * H:]],
                         bp1, params["pred_w2"][0], params["pred_w2"][1],
                         act_last=False)
    return scores


# ----------------------------------------------------------------------------
# Deterministic parameter init
# ----------------------------------------------------------------------------
def init_params(key, f_node, f_inter, hidden, n_gnn_layers, n_edge_scores, batch_norm):
    keys = iter(jax.random.split(key, 512))

    def lin(fan_in, fan_out, bias=True):
        bound = 1.0 / math.sqrt(fan_in)
        w = jax.random.uniform(next(keys), (fan_in, fan_out), jnp.float32, -bound, bound)
        if bias:
            b = jax.random.uniform(next(keys), (fan_out,), jnp.float32, -bound, bound)
        else:
            b = jnp.zeros((fan_out,), jnp.float32)
        return w, b

    # Mamba config: d_model=4, n_layers=2, d_state=16, expand=2, d_conv=4
    d_model, d_state, d_conv, expand, n_mamba_layers = 4, 16, 4, 2, 2
    ed = expand * d_model
    dt_rank = math.ceil(d_model / 16)

    mamba_layers = []
    for _ in range(n_mamba_layers):
        cbound = 1.0 / math.sqrt(d_conv)
        in_proj_w = lin(d_model, 2 * ed, bias=False)[0]
        conv_w = jax.random.uniform(next(keys), (ed, d_conv), jnp.float32, -cbound, cbound)
        conv_b = jax.random.uniform(next(keys), (ed,), jnp.float32, -cbound, cbound)
        x_proj_w = lin(ed, dt_rank + 2 * d_state, bias=False)[0]
        dt_w, dt_b = lin(dt_rank, ed)
        # Fold x_proj(delta part) @ dt_proj into one matrix; concat [delta|B|C].
        w_delta = x_proj_w[:, :dt_rank] @ dt_w                     # (ED, ED)
        dbc_w = jnp.concatenate(
            [w_delta,
             x_proj_w[:, dt_rank:dt_rank + d_state],
             x_proj_w[:, dt_rank + d_state:]], axis=1)             # (ED, ED+2Ns)
        dbc_b = jnp.concatenate([dt_b, jnp.zeros((2 * d_state,), jnp.float32)])
        mamba_layers.append(dict(
            norm_w=jnp.ones((d_model,), jnp.float32),
            in_proj_w=in_proj_w,
            conv_w=conv_w, conv_b=conv_b,
            dbc_w=dbc_w, dbc_b=dbc_b,
            A_log=jnp.log(jnp.tile(jnp.arange(1, d_state + 1, dtype=jnp.float32)[None, :], (ed, 1))),
            D=jnp.ones((ed,), jnp.float32),
            out_proj_w=lin(ed, d_model, bias=False)[0],
        ))

    gnn_layers = []
    for _ in range(n_gnn_layers):
        layer = dict(
            A1=lin(hidden, hidden), A2=lin(hidden, hidden), A3=lin(hidden, hidden),
            B1=lin(hidden, hidden), B2=lin(hidden, hidden), B3=lin(hidden, hidden),
            bn_h_g=jnp.ones((hidden,), jnp.float32), bn_h_b=jnp.zeros((hidden,), jnp.float32),
            bn_e_g=jnp.ones((hidden,), jnp.float32), bn_e_b=jnp.zeros((hidden,), jnp.float32),
        )
        # fused lane-dense gate projection for h: A1|A2|A3|B2|B3
        layer["W_h_cat"] = jnp.concatenate(
            [layer[k][0] for k in ("A1", "A2", "A3", "B2", "B3")], axis=1)
        layer["b_h_cat"] = jnp.concatenate(
            [layer[k][1] for k in ("A1", "A2", "A3", "B2", "B3")], axis=0)
        gnn_layers.append(layer)

    return dict(
        lin1_node=lin(f_node, f_inter),
        lin2_node=lin(f_inter, hidden),
        mix1=lin(2 * hidden, hidden),
        mix2=lin(hidden, hidden),
        lin1_edge=lin(4 * hidden, hidden),
        lin2_edge=lin(hidden, hidden),
        linear_base=lin(4, hidden),
        pred_w1=lin(3 * hidden, n_edge_scores),
        pred_w2=lin(n_edge_scores, 1),
        mamba_layers=mamba_layers,
        gnn_layers=gnn_layers,
        batch_norm=batch_norm,
    )


# ----------------------------------------------------------------------------
if __name__ == "__main__":
    key = jax.random.PRNGKey(0)
    k_x, k_e, k_r, k_len, k_src, k_dst, k_p = jax.random.split(key, 7)

    # small shapes
    N_NODES, N_EDGES, SEQ = 16, 32, 8
    NUM_NODE_F, NUM_EDGE_F = 8, 4
    NUM_INTER, HIDDEN = 16, 32
    NUM_LAYERS, EDGE_SCORES = 2, 16

    params = init_params(k_p, NUM_NODE_F, NUM_INTER, HIDDEN, NUM_LAYERS,
                         EDGE_SCORES, batch_norm=True)

    graph = dict(
        src=jax.random.randint(k_src, (N_EDGES,), 0, N_NODES),
        dst=jax.random.randint(k_dst, (N_EDGES,), 0, N_NODES),
        read_data=jax.random.normal(k_r, (N_NODES, SEQ, 4), jnp.float32),
        read_length=jax.random.randint(k_len, (N_NODES,), 1, SEQ + 1),
    )
    x = jax.random.normal(k_x, (N_NODES, NUM_NODE_F), jnp.float32)
    e = jax.random.normal(k_e, (N_EDGES, NUM_EDGE_F), jnp.float32)  # unused by forward (matches torch)

    scores = model_forward(params, graph, x, e)
    scores = jax.block_until_ready(scores)
    assert scores.shape == (N_EDGES, 1) and scores.dtype == jnp.float32
    assert bool(jnp.all(jnp.isfinite(scores)))
    print("KERNEL_OK")
</pallas_src>

<mosaic_0001>
module attributes {stable_mosaic.version = 11 : i64} {
  func.func @_fused_mlp2_kernel(%arg0: i32, %arg1: memref<16x8xbf16, #tpu.memory_space<vmem>>, %arg2: memref<8x16xbf16, #tpu.memory_space<vmem>>, %arg3: memref<1x16xf32, #tpu.memory_space<vmem>>, %arg4: memref<16x32xbf16, #tpu.memory_space<vmem>>, %arg5: memref<1x32xf32, #tpu.memory_space<vmem>>, %arg6: memref<16x32xf32, #tpu.memory_space<vmem>>) attributes {dimension_semantics = [#tpu.dimension_semantics<parallel>], iteration_bounds = array<i64: 1>, scalar_prefetch = 0 : i64, scratch_operands = 0 : i64, tpu.core_type = #tpu.core_type<tc>, window_params = [{transform_indices = @transform_0, window_bounds = array<i64: 16, 8>}, {pipeline_mode = #tpu.pipeline_mode<synchronous>, transform_indices = @transform_1, window_bounds = array<i64: 8, 16>}, {pipeline_mode = #tpu.pipeline_mode<synchronous>, transform_indices = @transform_2, window_bounds = array<i64: 1, 16>}, {pipeline_mode = #tpu.pipeline_mode<synchronous>, transform_indices = @transform_3, window_bounds = array<i64: 16, 32>}, {pipeline_mode = #tpu.pipeline_mode<synchronous>, transform_indices = @transform_4, window_bounds = array<i64: 1, 32>}, {transform_indices = @transform_5, window_bounds = array<i64: 16, 32>}]} {
    %c0 = arith.constant 0 : index
    %c0_0 = arith.constant 0 : index
    %0 = vector.load %arg1[%c0, %c0_0] : memref<16x8xbf16, #tpu.memory_space<vmem>>, vector<16x8xbf16>
    %c0_1 = arith.constant 0 : index
    %c0_2 = arith.constant 0 : index
    %1 = vector.load %arg2[%c0_1, %c0_2] : memref<8x16xbf16, #tpu.memory_space<vmem>>, vector<8x16xbf16>
    %cst = arith.constant dense<0.000000e+00> : vector<16x16xf32>
    %2 = tpu.matmul %0, %1, %cst {dimension_numbers = #tpu.dot_dimension_numbers<[1], [0], [0], [1], [0, 0, 1, 1], [], []>} : vector<16x8xbf16>, vector<8x16xbf16>, vector<16x16xf32> -> vector<16x16xf32>
    %c0_3 = arith.constant 0 : index
    %c0_4 = arith.constant 0 : index
    %3 = vector.load %arg3[%c0_3, %c0_4] : memref<1x16xf32, #tpu.memory_space<vmem>>, vector<1x16xf32>
    %4 = vector.broadcast %3 : vector<1x16xf32> to vector<16x16xf32>
    %5 = arith.addf %2, %4 : vector<16x16xf32>
    %cst_5 = arith.constant 0.000000e+00 : f32
    %6 = vector.broadcast %cst_5 : f32 to vector<16x16xf32>
    %7 = arith.maximumf %5, %6 : vector<16x16xf32>
    %8 = arith.truncf %7 : vector<16x16xf32> to vector<16x16xbf16>
    %c0_6 = arith.constant 0 : index
    %c0_7 = arith.constant 0 : index
    %9 = vector.load %arg4[%c0_6, %c0_7] : memref<16x32xbf16, #tpu.memory_space<vmem>>, vector<16x32xbf16>
    %cst_8 = arith.constant dense<0.000000e+00> : vector<16x32xf32>
    %10 = tpu.matmul %8, %9, %cst_8 {dimension_numbers = #tpu.dot_dimension_numbers<[1], [0], [0], [1], [0, 0, 1, 1], [], []>} : vector<16x16xbf16>, vector<16x32xbf16>, vector<16x32xf32> -> vector<16x32xf32>
    %c0_9 = arith.constant 0 : index
    %c0_10 = arith.constant 0 : index
    %11 = vector.load %arg5[%c0_9, %c0_10] : memref<1x32xf32, #tpu.memory_space<vmem>>, vector<1x32xf32>
    %12 = vector.broadcast %11 : vector<1x32xf32> to vector<16x32xf32>
    %13 = arith.addf %10, %12 : vector<16x32xf32>
    %c0_11 = arith.constant 0 : index
    %c0_12 = arith.constant 0 : index
    %14 = vector.load %arg6[%c0_11, %c0_12] : memref<16x32xf32, #tpu.memory_space<vmem>>, vector<16x32xf32>
    tpu.vector_store %arg6[%c0_11, %c0_12], %13 {strides = array<i32>} : memref<16x32xf32, #tpu.memory_space<vmem>>, vector<16x32xf32>,
    return
  }
  func.func @transform_0(%arg0: i32) -> (i32, i32) {
    %c0_i32 = arith.constant 0 : i32
    %c0_i32_0 = arith.constant 0 : i32
    return %arg0, %c0_i32 : i32, i32
  }
  func.func @transform_1(%arg0: i32) -> (i32, i32) {
    %c0_i32 = arith.constant 0 : i32
    %c0_i32_0 = arith.constant 0 : i32
    %c0_i32_1 = arith.constant 0 : i32
    return %c0_i32, %c0_i32_0 : i32, i32
  }
  func.func @transform_2(%arg0: i32) -> (i32, i32) {
    %c0_i32 = arith.constant 0 : i32
    %c0_i32_0 = arith.constant 0 : i32
    %c0_i32_1 = arith.constant 0 : i32
    return %c0_i32, %c0_i32_0 : i32, i32
  }
  func.func @transform_3(%arg0: i32) -> (i32, i32) {
    %c0_i32 = arith.constant 0 : i32
    %c0_i32_0 = arith.constant 0 : i32
    %c0_i32_1 = arith.constant 0 : i32
    return %c0_i32, %c0_i32_0 : i32, i32
  }
  func.func @transform_4(%arg0: i32) -> (i32, i32) {
    %c0_i32 = arith.constant 0 : i32
    %c0_i32_0 = arith.constant 0 : i32
    %c0_i32_1 = arith.constant 0 : i32
    return %c0_i32, %c0_i32_0 : i32, i32
  }
  func.func @transform_5(%arg0: i32) -> (i32, i32) {
    %c0_i32 = arith.constant 0 : i32
    %c0_i32_0 = arith.constant 0 : i32
    return %arg0, %c0_i32 : i32, i32
  }
}

</mosaic_0001>

<bundles_post_ra>
// kernel: tpu_custom_call.1
= control target key start
LH: loop header
LB: loop body
LE: loop exit
PB: predicated region body
PF: predicated region fallthrough
CT: control target
= control target key end

     0   :  { %vm41_vm0 = vcmask 1043456   ;;  %v221_v1 = vmov 0.0   ;;  %vm222_vm1 = vmmov 0   ;;  %vm37_vm2 = vcmask 64512   ;;  %s283_s0 = inlined_call_operand.vmem [shape: bf16[16,8], index: 0, kind: input, shape index: {}]   ;;  %s284_s1 = inlined_call_operand.vmem [shape: bf16[8,16], index: 1, kind: input, shape index: {}]   ;;  %s285_s2 = inlined_call_operand.vmem [shape: f32[1,16], index: 2, kind: input, shape index: {}]   ;;  %s286_s3 = inlined_call_operand.vmem [shape: bf16[16,32], index: 3, kind: input, shape index: {}]   ;;  %s287_s4 = inlined_call_operand.vmem [shape: f32[1,32], index: 4, kind: input, shape index: {}]   ;;  %s288_s5 = inlined_call_operand.hbm [shape: f32[16,32], index: 5, kind: output, shape index: {}]  }
   0x1   :  { %v24_v0 = vld [vmem:[%s284_s1] sm:$0xf]  ;;  %178 = vmatprep.subr.bf16.mxu0 %v221_v1  ;;  %180 = vmatprep.mubr.msk.bf16.mxu0 %vm222_vm1, %v221_v1 }
   0x2   :  { %v43_v2 = vsel %vm41_vm0, %v24_v0, 0  ;;  %v195_v3 = vld [vmem:[%s283_s0] sm:$0xff]   ;;  %184 = vmatprep.subr.bf16.mxu1 %v221_v1  ;;  %186 = vmatprep.mubr.msk.bf16.mxu1 %vm222_vm1, %v221_v1 }
   0x3   :  { %179 = vmatpush3.bf16.msra.mxu0 %v43_v2 }
   0x4   :  { %10 = vsyncpa [#allocation3], 0  ;;  %v196_v4 = vld [vmem:[%s286_s3] sm:$0xff]   ;;  %vm104_vm3 = vcmask 130048   ;;  %s223_s3 = smov [#allocation2]   ;;  %vm149_vm4 = vcmask 261120  }
   0x5   :  { %185 = vmatpush3.bf16.msra.mxu1 %v196_v4  ;;  %v168_v5 = vld [vmem:[%s285_s2] ss:$0 sm:$0xff]  ;;  %s157_s26 = sshll.u32 %s223_s3, 4  ;;  %s158_s26 = int_to_ptr.vmem [resolvable:$true] %s157_s26 }
   0x6   :  { %181 = vmatmul.mubr.msk.bf16.vlgmr.msra.gmra.mrb[0].mxu0 %vm37_vm2, %v195_v3  ;;  %v171_v15 = vld [vmem:[%s287_s4] ss:$0 sm:$0xff]  ;;  %s197_s2 = scalar_lea.vmem %s158_s26, 256  ;;  %p202_p1 = scmp.lt.s32.totalorder %s158_s26, %s158_s26 }
   0x7   :  { %p198_p0 = scmp.ne.s32.totalorder %s158_s26, %s197_s2  ;;  %p203_p2 = scmp.lt.s32.totalorder %s197_s2, %s197_s2 }
   0x9   :  { %p204_p3 = por %p203_p2, %p202_p1 }
   0xb   :  { %p205_p4 = pnand %p204_p3, %p198_p0 }
  0xd9   :  { %v79_v6 = vpop.f32.mrb[0].mxu0 }
  0xda   :  { %v80_v7 = vadd.f32 %v168_v5, %v79_v6  ;;  %v182_v8 = vpop.f32.mrb[1].mxu0 }
  0xdb   :  { %v82_v9 = vpop.f32.mrb[2].mxu0 }
  0xdc   :  { %v83_v10 = vadd.f32 %v168_v5, %v82_v9  ;;  %v183_v11 = vpop.f32.mrb[3].mxu0  ;;  %v86_v12 = vmax.f32 %v80_v7, 0.0 }
  0xde   :  { %v87_v13 = vmax.f32 %v83_v10, 0.0 }
  0xe0   :  { %v88_v14 = vpack.c.bf16 %v87_v13, %v86_v12 }
  0xe2   :  { %187 = vmatmul.mubr.msk.bf16.vlgmr.msra.gmra.mrb[0].mxu1 %vm104_vm3, %v88_v14 }
 0x1b5   :  { %v142_v16 = vpop.f32.mrb[0].mxu1 }
 0x1b6   :  { %v143_v17 = vadd.f32 %v171_v15, %v142_v16  ;;  %v188_v18 = vpop.f32.mrb[1].mxu1 }
 0x1b7   :  { %v145_v19 = vpop.f32.mrb[2].mxu1 }
 0x1b8   :  { %150 = vst.msk [vmem:[#allocation2] sm:$0xff] %vm149_vm4, %v143_v17  ;;  %v146_v20 = vadd.f32 %v171_v15, %v145_v19  ;;  %v189_v21 = vpop.f32.mrb[3].mxu1 }
 0x1ba   :  { %151 = vst.msk [vmem:[#allocation2 + $0x8] sm:$0xff] %vm149_vm4, %v146_v20 }
 0x1bb   :  { %208 = shalt.err (!%p205_p4)
}
 0x1bc   :  { %s209_s28 = scalar_lea.hbm %s288_s5, 256 }
 0x1bd   :  { %p210_p5 = scmp.ne.s32.totalorder %s288_s5, %s209_s28  ;;  %p213_p6 = scmp.lt.u32.totalorder %s209_s28, %s288_s5 }
 0x1bf   :  { %p215_p7 = pnand %p213_p6, %p210_p5 }
 0x1c1   :  { %218 = shalt.err (!%p215_p7)
}
 0x1c2   :  { %s224_s8 = smov 128   ;;  %s225_s9 = smov 8  }
 0x1c3   :  { %163 = dma.vmem_to_hbm [thread:$0]  %s158_s26, 256, %s288_s5, [#allocation3], %s224_s8, %s224_s8, %s225_s9  }
 0x1c4   :  { %219 = dma.done.wait [#allocation3], 256  }
 0x1c5   :  { %220 = vsyncadd [#allocation3], 4294967040 }
 0x1c6   :  { %167 = vsyncpa [#allocation3], 1 }

</bundles_post_ra>
